<compile_context>
chip_gen: v5e
topology: v5e:2x2
jax: 0.10.0
libtpu: 0.0.40
codegen_flags: <defaults>
</compile_context>

<pallas_src>
import functools

import jax
import jax.numpy as jnp
from jax.experimental import pallas as pl
from jax.experimental.pallas import tpu as pltpu


def _round_up(x, m):
    return ((x + m - 1) // m) * m


def _mlp_kernel(n_layers, negative_slope, x_ref, *refs):
    """Fused channel-major pointwise-MLP kernel.

    x_ref : (1, C_in, TM)        tile of pixels (pixels on the lane axis)
    refs  : w0, b0, w1, b1, ..., out_ref
            w_i : (C_out_i, C_in_i)   full weight, VMEM-resident across steps
            b_i : (C_out_i, 1)
    out   : (1, C_out, TM)
    """
    out_ref = refs[-1]
    params = refs[:-1]

    h = x_ref[0].astype(jnp.float32)                      # (C_in, TM)
    for i in range(n_layers):
        w = params[2 * i][...].astype(jnp.float32)        # (C_out_i, C_in_i)
        b = params[2 * i + 1][...].astype(jnp.float32)    # (C_out_i, 1)
        h = jnp.dot(w, h, preferred_element_type=jnp.float32) + b
        if i < n_layers - 1:                              # LeakyReLU between hidden layers only
            h = jnp.where(h > 0, h, negative_slope * h)
    out_ref[0] = h.astype(out_ref.dtype)


def data_generator_forward(x_nchw, weights, biases, *, tile_pixels=8192,
                           negative_slope=0.01):
    """Applies the stack of 1x1 convs (pointwise MLP) to an NCHW input.

    weights[i] : (C_out_i, C_in_i)   (PyTorch Conv2d weight (out,in,1,1) squeezed)
    biases[i]  : (C_out_i, 1)
    """
    B, C_in, H, W = x_nchw.shape
    n_layers = len(weights)
    C_out = weights[-1].shape[0]
    n_pix = H * W

    # Pixel-tile size: multiple of 128 (lane-dense), capped by the image size.
    tm = min(tile_pixels, _round_up(n_pix, 128))
    n_pix_pad = _round_up(n_pix, tm)

    # NCHW -> (B, C, H*W): contiguous reshape, no data movement in HBM.
    x_rows = x_nchw.reshape(B, C_in, n_pix)
    if n_pix_pad != n_pix:
        # Pad the pixel axis so any bandwidth-optimal tile size works; the
        # padded (garbage) pixels are sliced off below.
        x_rows = jnp.pad(x_rows, ((0, 0), (0, 0), (0, n_pix_pad - n_pix)))

    grid = (B, n_pix_pad // tm)

    # x tiled over (batch, pixel-tile); params passed whole (tiny, VMEM-resident).
    in_specs = [pl.BlockSpec((1, C_in, tm), lambda b, i: (b, 0, i))]
    args = [x_rows]
    for w, b in zip(weights, biases):
        in_specs.append(pl.BlockSpec(w.shape, lambda bb, ii: (0, 0)))
        in_specs.append(pl.BlockSpec(b.shape, lambda bb, ii: (0, 0)))
        args.append(w)
        args.append(b)

    out = pl.pallas_call(
        functools.partial(_mlp_kernel, n_layers, negative_slope),
        out_shape=jax.ShapeDtypeStruct((B, C_out, n_pix_pad), x_nchw.dtype),
        grid_spec=pltpu.PrefetchScalarGridSpec(
            num_scalar_prefetch=0,
            grid=grid,
            in_specs=in_specs,
            out_specs=pl.BlockSpec((1, C_out, tm), lambda b, i: (b, 0, i)),
        ),
        # Both grid axes are embarrassingly parallel -> megacore sharding on v7x.
        compiler_params=pltpu.CompilerParams(
            dimension_semantics=("parallel", "parallel")),
    )(*args)

    if n_pix_pad != n_pix:
        out = out[:, :, :n_pix]
    # (B, C_out, H*W) -> NCHW: free reshape.
    return out.reshape(B, C_out, H, W)


def init_params(key, cfg):
    """Deterministic init matching the layer shapes of DataGenerator.__init__."""
    hiden = cfg['data_hiden']
    input_dim = cfg['ctrl'] + 2
    data_dim = cfg['data_dim']
    dims = [input_dim] + list(hiden) + [data_dim]

    weights, biases = [], []
    for i in range(len(dims) - 1):
        key, kw, kb = jax.random.split(key, 3)
        fan_in = dims[i]
        bound = 1.0 / jnp.sqrt(fan_in)
        # PyTorch Conv2d weight is (out, in, 1, 1); we store it as (out, in)
        # so the kernel computes h = W @ x with channel-major activations.
        w = jax.random.uniform(kw, (dims[i + 1], dims[i]), jnp.float32,
                               minval=-bound, maxval=bound)
        b = jax.random.uniform(kb, (dims[i + 1], 1), jnp.float32,
                               minval=-bound, maxval=bound)
        weights.append(w)
        biases.append(b)
    return weights, biases


if __name__ == "__main__":
    cfg = {'data_hiden': [32, 32], 'ctrl': 2, 'data_dim': 3}
    B, H, W = 2, 16, 16
    input_dim = cfg['ctrl'] + 2  # 4

    key = jax.random.PRNGKey(0)
    key, kx = jax.random.split(key)
    x = jax.random.normal(kx, (B, input_dim, H, W), jnp.float32)

    weights, biases = init_params(key, cfg)

    y = data_generator_forward(x, weights, biases)
    y = jax.block_until_ready(y)

    # Quick sanity check against a plain-JAX reference of the same math.
    def ref(x_nchw):
        h = x_nchw.reshape(B, input_dim, H * W)
        for i, (w, b) in enumerate(zip(weights, biases)):
            h = jnp.einsum('oc,bcp->bop', w, h) + b[None]
            if i < len(weights) - 1:
                h = jnp.where(h > 0, h, 0.01 * h)
        return h.reshape(B, -1, H, W)

    assert y.shape == (B, cfg['data_dim'], H, W)
    assert jnp.allclose(y, ref(x), atol=1e-5, rtol=1e-5)
    print("KERNEL_OK")
</pallas_src>

<mosaic_0001>
module attributes {stable_mosaic.version = 11 : i64} {
  func.func @_mlp_kernel(%arg0: i32, %arg1: i32, %arg2: memref<1x4x256xf32, #tpu.memory_space<vmem>>, %arg3: memref<32x4xf32, #tpu.memory_space<vmem>>, %arg4: memref<32x1xf32, #tpu.memory_space<vmem>>, %arg5: memref<32x32xf32, #tpu.memory_space<vmem>>, %arg6: memref<32x1xf32, #tpu.memory_space<vmem>>, %arg7: memref<3x32xf32, #tpu.memory_space<vmem>>, %arg8: memref<3x1xf32, #tpu.memory_space<vmem>>, %arg9: memref<1x3x256xf32, #tpu.memory_space<vmem>>) attributes {dimension_semantics = [#tpu.dimension_semantics<parallel>, #tpu.dimension_semantics<parallel>], iteration_bounds = array<i64: 2, 1>, scalar_prefetch = 0 : i64, scratch_operands = 0 : i64, tpu.core_type = #tpu.core_type<tc>, window_params = [{transform_indices = @transform_0, window_bounds = array<i64: 1, 4, 256>}, {pipeline_mode = #tpu.pipeline_mode<synchronous>, transform_indices = @transform_1, window_bounds = array<i64: 32, 4>}, {pipeline_mode = #tpu.pipeline_mode<synchronous>, transform_indices = @transform_2, window_bounds = array<i64: 32, 1>}, {pipeline_mode = #tpu.pipeline_mode<synchronous>, transform_indices = @transform_3, window_bounds = array<i64: 32, 32>}, {pipeline_mode = #tpu.pipeline_mode<synchronous>, transform_indices = @transform_4, window_bounds = array<i64: 32, 1>}, {pipeline_mode = #tpu.pipeline_mode<synchronous>, transform_indices = @transform_5, window_bounds = array<i64: 3, 32>}, {pipeline_mode = #tpu.pipeline_mode<synchronous>, transform_indices = @transform_6, window_bounds = array<i64: 3, 1>}, {transform_indices = @transform_7, window_bounds = array<i64: 1, 3, 256>}]} {
    %c0 = arith.constant 0 : index
    %c0_0 = arith.constant 0 : index
    %c0_1 = arith.constant 0 : index
    %0 = vector.load %arg2[%c0, %c0_0, %c0_1] : memref<1x4x256xf32, #tpu.memory_space<vmem>>, vector<1x4x256xf32>
    %1 = vector.shape_cast %0 : vector<1x4x256xf32> to vector<4x256xf32>
    %c0_2 = arith.constant 0 : index
    %c0_3 = arith.constant 0 : index
    %2 = vector.load %arg3[%c0_2, %c0_3] : memref<32x4xf32, #tpu.memory_space<vmem>>, vector<32x4xf32>
    %c0_4 = arith.constant 0 : index
    %c0_5 = arith.constant 0 : index
    %3 = vector.load %arg4[%c0_4, %c0_5] : memref<32x1xf32, #tpu.memory_space<vmem>>, vector<32x1xf32>
    %cst = arith.constant dense<0.000000e+00> : vector<32x256xf32>
    %4 = tpu.matmul %2, %1, %cst {dimension_numbers = #tpu.dot_dimension_numbers<[1], [0], [0], [1], [0, 0, 1, 1], [], []>} : vector<32x4xf32>, vector<4x256xf32>, vector<32x256xf32> -> vector<32x256xf32>
    %5 = vector.broadcast %3 : vector<32x1xf32> to vector<32x256xf32>
    %6 = arith.addf %4, %5 : vector<32x256xf32>
    %cst_6 = arith.constant 0.000000e+00 : f32
    %7 = vector.broadcast %cst_6 : f32 to vector<32x256xf32>
    %8 = arith.cmpf ogt, %6, %7 : vector<32x256xf32>
    %cst_7 = arith.constant 0.00999999977 : f32
    %9 = vector.broadcast %cst_7 : f32 to vector<32x256xf32>
    %10 = arith.mulf %9, %6 : vector<32x256xf32>
    %11 = arith.select %8, %6, %10 : vector<32x256xi1>, vector<32x256xf32>
    %c0_8 = arith.constant 0 : index
    %c0_9 = arith.constant 0 : index
    %12 = vector.load %arg5[%c0_8, %c0_9] : memref<32x32xf32, #tpu.memory_space<vmem>>, vector<32x32xf32>
    %c0_10 = arith.constant 0 : index
    %c0_11 = arith.constant 0 : index
    %13 = vector.load %arg6[%c0_10, %c0_11] : memref<32x1xf32, #tpu.memory_space<vmem>>, vector<32x1xf32>
    %cst_12 = arith.constant dense<0.000000e+00> : vector<32x256xf32>
    %14 = tpu.matmul %12, %11, %cst_12 {dimension_numbers = #tpu.dot_dimension_numbers<[1], [0], [0], [1], [0, 0, 1, 1], [], []>} : vector<32x32xf32>, vector<32x256xf32>, vector<32x256xf32> -> vector<32x256xf32>
    %15 = vector.broadcast %13 : vector<32x1xf32> to vector<32x256xf32>
    %16 = arith.addf %14, %15 : vector<32x256xf32>
    %cst_13 = arith.constant 0.000000e+00 : f32
    %17 = vector.broadcast %cst_13 : f32 to vector<32x256xf32>
    %18 = arith.cmpf ogt, %16, %17 : vector<32x256xf32>
    %cst_14 = arith.constant 0.00999999977 : f32
    %19 = vector.broadcast %cst_14 : f32 to vector<32x256xf32>
    %20 = arith.mulf %19, %16 : vector<32x256xf32>
    %21 = arith.select %18, %16, %20 : vector<32x256xi1>, vector<32x256xf32>
    %c0_15 = arith.constant 0 : index
    %c0_16 = arith.constant 0 : index
    %22 = vector.load %arg7[%c0_15, %c0_16] : memref<3x32xf32, #tpu.memory_space<vmem>>, vector<3x32xf32>
    %c0_17 = arith.constant 0 : index
    %c0_18 = arith.constant 0 : index
    %23 = vector.load %arg8[%c0_17, %c0_18] : memref<3x1xf32, #tpu.memory_space<vmem>>, vector<3x1xf32>
    %cst_19 = arith.constant dense<0.000000e+00> : vector<3x256xf32>
    %24 = tpu.matmul %22, %21, %cst_19 {dimension_numbers = #tpu.dot_dimension_numbers<[1], [0], [0], [1], [0, 0, 1, 1], [], []>} : vector<3x32xf32>, vector<32x256xf32>, vector<3x256xf32> -> vector<3x256xf32>
    %25 = vector.broadcast %23 : vector<3x1xf32> to vector<3x256xf32>
    %26 = arith.addf %24, %25 : vector<3x256xf32>
    %c0_20 = arith.constant 0 : index
    %c0_21 = arith.constant 0 : index
    %c0_22 = arith.constant 0 : index
    %27 = vector.load %arg9[%c0_20, %c0_21, %c0_22] : memref<1x3x256xf32, #tpu.memory_space<vmem>>, vector<1x3x256xf32>
    %28 = vector.shape_cast %27 : vector<1x3x256xf32> to vector<3x256xf32>
    %29 = vector.shape_cast %26 : vector<3x256xf32> to vector<1x3x256xf32>
    tpu.vector_store %arg9[%c0_20, %c0_21, %c0_22], %29 {strides = array<i32>} : memref<1x3x256xf32, #tpu.memory_space<vmem>>, vector<1x3x256xf32>,
    return
  }
  func.func @transform_0(%arg0: i32, %arg1: i32) -> (i32, i32, i32) {
    %c0_i32 = arith.constant 0 : i32
    %c0_i32_0 = arith.constant 0 : i32
    return %arg0, %c0_i32, %arg1 : i32, i32, i32
  }
  func.func @transform_1(%arg0: i32, %arg1: i32) -> (i32, i32) {
    %c0_i32 = arith.constant 0 : i32
    %c0_i32_0 = arith.constant 0 : i32
    %c0_i32_1 = arith.constant 0 : i32
    return %c0_i32, %c0_i32_0 : i32, i32
  }
  func.func @transform_2(%arg0: i32, %arg1: i32) -> (i32, i32) {
    %c0_i32 = arith.constant 0 : i32
    %c0_i32_0 = arith.constant 0 : i32
    %c0_i32_1 = arith.constant 0 : i32
    return %c0_i32, %c0_i32_0 : i32, i32
  }
  func.func @transform_3(%arg0: i32, %arg1: i32) -> (i32, i32) {
    %c0_i32 = arith.constant 0 : i32
    %c0_i32_0 = arith.constant 0 : i32
    %c0_i32_1 = arith.constant 0 : i32
    return %c0_i32, %c0_i32_0 : i32, i32
  }
  func.func @transform_4(%arg0: i32, %arg1: i32) -> (i32, i32) {
    %c0_i32 = arith.constant 0 : i32
    %c0_i32_0 = arith.constant 0 : i32
    %c0_i32_1 = arith.constant 0 : i32
    return %c0_i32, %c0_i32_0 : i32, i32
  }
  func.func @transform_5(%arg0: i32, %arg1: i32) -> (i32, i32) {
    %c0_i32 = arith.constant 0 : i32
    %c0_i32_0 = arith.constant 0 : i32
    %c0_i32_1 = arith.constant 0 : i32
    return %c0_i32, %c0_i32_0 : i32, i32
  }
  func.func @transform_6(%arg0: i32, %arg1: i32) -> (i32, i32) {
    %c0_i32 = arith.constant 0 : i32
    %c0_i32_0 = arith.constant 0 : i32
    %c0_i32_1 = arith.constant 0 : i32
    return %c0_i32, %c0_i32_0 : i32, i32
  }
  func.func @transform_7(%arg0: i32, %arg1: i32) -> (i32, i32, i32) {
    %c0_i32 = arith.constant 0 : i32
    %c0_i32_0 = arith.constant 0 : i32
    return %arg0, %c0_i32, %arg1 : i32, i32, i32
  }
}

</mosaic_0001>

<bundles_post_ra>
// kernel: tpu_custom_call.1
= control target key start
LH: loop header
LB: loop body
LE: loop exit
PB: predicated region body
PF: predicated region fallthrough
CT: control target
= control target key end

     0   :  { %s843_s24 = smov 0   ;;  %s845_s25 = smov 0   ;;  %s958_s0 = inlined_call_operand.vmem [shape: f32[2,4,256], index: 0, kind: input, shape index: {}]   ;;  %s959_s1 = inlined_call_operand.vmem [shape: f32[32,4], index: 1, kind: input, shape index: {}]   ;;  %s960_s2 = inlined_call_operand.vmem [shape: f32[32,1], index: 2, kind: input, shape index: {}]   ;;  %s961_s3 = inlined_call_operand.vmem [shape: f32[32,32], index: 3, kind: input, shape index: {}]   ;;  %s962_s4 = inlined_call_operand.vmem [shape: f32[32,1], index: 4, kind: input, shape index: {}]   ;;  %s963_s5 = inlined_call_operand.vmem [shape: f32[3,32], index: 5, kind: input, shape index: {}]   ;;  %s964_s6 = inlined_call_operand.vmem [shape: f32[3,1], index: 6, kind: input, shape index: {}]   ;;  %s965_s7 = inlined_call_operand.vmem [shape: f32[2,3,256], index: 7, kind: output, shape index: {}]  }
   0x1   :  { %s847_s26 = smov 0  }
   0x2 LB: > { %s29_s27 = sadd.s32 1, %s796_s25  ;;  %p721_p0 = scmp.ge.s32.totalorder %s800_s26, 1  ;;  %s800_s26 = sphi %s847_s26, %s17_s26   ;;  %s796_s25 = sphi %s845_s25, %s967_s25   ;;  %s792_s24 = sphi %s843_s24, %s966_s24  }
   0x3   : > { %p31_p1 = scmp.ge.s32.totalorder %s29_s27, 2  ;;  %p258_p2 = scmp.lt.s32.totalorder %s800_s26, 3 }
   0x5   : > { %s969_s27 = smov (%p31_p1, %s29_s27), 0  ;;  %p259_p3 = pnand %p721_p0, %p258_p2 }
   0x6   : > { %p299_p4 = scmp.lt.s32.totalorder (!%p259_p3), %s792_s24, 1 }
   0x7   : > { %262 = sbr.rel (%p259_p3) target bundleno = 487 (0x1e7), region = 48 }
   0xc   : > { %v324_v0 = vld [vmem:[%s960_s2 + $0x8] sm:$0xff]  ;;  %v802_v1 = vmov 0   ;;  %v326_v2 = vld [vmem:[%s960_s2 + $0x18] sm:$0xff]  ;;  %s971_s24 = smov (!%p299_p4, %s792_s24), 1  ;;  %v323_v4 = vld [vmem:[%s960_s2] sm:$0xff]  ;;  %vm364_vm0 = vcmask 1043456  }
   0xd   : > { %776 = vset.pattern.permute.xlu1 %v802_v1  ;;  %775 = vset.pattern.permute.xlu0 %v802_v1  ;;  %s748_s9 = sshll.u32 %s971_s24, 3  ;;  %v325_v5 = vld [vmem:[%s960_s2 + $0x10] sm:$0xff]  ;;  %v319_v6 = vld [vmem:[%s959_s1] sm:$0xff]  ;;  %vm351_vm1 = vcmask 31744   ;;  %v456_v9 = vld [vmem:[%s962_s4 + $0x8] sm:$0xff]  ;;  %vm479_vm10 = vcmask 261120  }
   0xe   : > { %334 = vperm.xlu1 %776, %v324_v0   ;;  %344 = vperm.xlu0 %775, %v326_v2   ;;  %s306_s12 = scalar_lea.vmem %s958_s0, %s748_s9  ;;  %v455_v10 = vld [vmem:[%s962_s4] sm:$0xff]  ;;  %v320_v11 = vld [vmem:[%s959_s1 + $0x8] sm:$0xff]  ;;  %v321_v12 = vld [vmem:[%s959_s1 + $0x10] sm:$0xff]  ;;  %s316_s11 = scalar_lea.vmem %s965_s7, %s748_s9 }
   0xf   : > { %777 = vset.pattern.permute.xlu2 %v802_v1  ;;  %v318_v3 = vld [vmem:[%s306_s12] sm:$0xff]  ;;  %v322_v13 = vld [vmem:[%s959_s1 + $0x18] sm:$0xff]  ;;  %v457_v52 = vld [vmem:[%s962_s4 + $0x10] sm:$0xff] }
  0x10   : > { %348 = vst [vmem:[#allocation1] ss:$2 sm:$0xff] %v318_v3  ;;  %v458_v42 = vld [vmem:[%s962_s4 + $0x18] sm:$0xff]  ;;  %v451_v49 = vld [vmem:[%s961_s3] sm:$0xff]  ;;  %v452_v53 = vld [vmem:[%s961_s3 + $0x8] sm:$0xff] }
  0x11   : > { %476 = vperm.xlu2 %777, %v458_v42   ;;  %v575_v54 = vld [vmem:[%s964_s6] sm:$0x7]  ;;  %v453_v55 = vld [vmem:[%s961_s3 + $0x10] sm:$0xff]  ;;  %v454_v56 = vld [vmem:[%s961_s3 + $0x18] sm:$0xff] }
  0x16   : > { %329 = vperm.xlu1 %776, %v323_v4   ;;  %339 = vperm.xlu0 %775, %v325_v5  }
  0x17   : > { %v349_v7 = vld.sshfl [vmem:[#allocation1] sm:$0xff pattern:$0x75316420]  ;;  %v350_v8 = vld.sshfl [vmem:[#allocation1 + $0x8] sm:$0xff pattern:$0x75316420] }
  0x18   : > { %726 = vmatpush.msk.msra.mxu0 %vm364_vm0, %v349_v7  ;;  %731 = vmatpush.msk.msra.mxu1 %vm364_vm0, %v350_v8 }
  0x19   : > { %727 = vmatmul.msk.f32.vlgmr.msra.gmra.mxu0 %vm351_vm1, %v319_v6  ;;  %732 = vmatmul.msk.f32.vlgmr.msra.gmra.mxu1 %vm351_vm1, %v319_v6 }
  0x1a   : > { %471 = vperm.xlu2 %777, %v457_v52  }
  0x1e   : > { %466 = vperm.xlu0 %775, %v456_v9   ;;  %461 = vperm.xlu1 %776, %v455_v10  }
  0x21   : > { %728 = vmatmul.msk.f32.gmra.mxu0 %vm351_vm1, %v320_v11  ;;  %733 = vmatmul.msk.f32.gmra.mxu1 %vm351_vm1, %v320_v11 }
  0x22   : > { %578 = vperm.xlu2 %777, %v575_v54  }
  0x29   : > { %729 = vmatmul.msk.f32.gmra.mxu0 %vm351_vm1, %v321_v12  ;;  %734 = vmatmul.msk.f32.gmra.mxu1 %vm351_vm1, %v321_v12 }
  0x31   : > { %730 = vmatmul.msk.f32.gmra.mxu0 %vm351_vm1, %v322_v13  ;;  %735 = vmatmul.msk.f32.gmra.mxu1 %vm351_vm1, %v322_v13 }
  0x6b   : > { %v477_v61 = vpop.permute.xlu2 %476 }
  0x74   : > { %v472_v0 = vpop.permute.xlu2 %471 }
  0x80   : > { %v345_v18 = vpop.permute.xlu0 %344  ;;  %v335_v19 = vpop.permute.xlu1 %334 }
  0x88   : > { %v340_v22 = vpop.permute.xlu0 %339  ;;  %v330_v25 = vpop.permute.xlu1 %329 }
  0x90   : > { %v467_v3 = vpop.permute.xlu0 %466  ;;  %v462_v6 = vpop.permute.xlu1 %461 }
  0x96   : > { %v386_v14 = vpop.f32.mrf.mxu0  ;;  %v415_v15 = vpop.f32.mrf.mxu1 }
  0x97   : > { %v387_v32 = vadd.f32 %v386_v14, %v330_v25  ;;  %v416_v33 = vadd.f32 %v415_v15, %v330_v25 }
  0x99   : > { %v435_v45 = vmul.f32 0.01, %v387_v32  ;;  %v436_v46 = vmul.f32 0.01, %v416_v33  ;;  %vm427_vm8 = vcmp.gt.f32.partialorder %v387_v32, 0.0  ;;  %vm428_vm9 = vcmp.gt.f32.partialorder %v416_v33, 0.0 }
  0x9b   : > { %v443_v50 = vsel %vm427_vm8, %v387_v32, %v435_v45  ;;  %v444_v51 = vsel %vm428_vm9, %v416_v33, %v436_v46 }
  0x9e   : > { %v389_v16 = vpop.f32.mrf.mxu0  ;;  %v418_v17 = vpop.f32.mrf.mxu1 }
  0x9f   : > { %v390_v28 = vadd.f32 %v389_v16, %v335_v19  ;;  %v419_v29 = vadd.f32 %v418_v17, %v335_v19 }
  0xa1   : > { %v437_v40 = vmul.f32 0.01, %v390_v28  ;;  %v438_v41 = vmul.f32 0.01, %v419_v29  ;;  %vm429_vm6 = vcmp.gt.f32.partialorder %v390_v28, 0.0  ;;  %vm430_vm7 = vcmp.gt.f32.partialorder %v419_v29, 0.0 }
  0xa3   : > { %v445_v47 = vsel %vm429_vm6, %v390_v28, %v437_v40  ;;  %v446_v48 = vsel %vm430_vm7, %v419_v29, %v438_v41 }
  0xa6   : > { %v392_v20 = vpop.f32.mrf.mxu0  ;;  %v421_v21 = vpop.f32.mrf.mxu1 }
  0xa7   : > { %v393_v23 = vadd.f32 %v392_v20, %v340_v22  ;;  %v422_v24 = vadd.f32 %v421_v21, %v340_v22 }
  0xa9   : > { %v439_v34 = vmul.f32 0.01, %v393_v23  ;;  %v440_v35 = vmul.f32 0.01, %v422_v24  ;;  %vm431_vm4 = vcmp.gt.f32.partialorder %v393_v23, 0.0  ;;  %vm432_vm5 = vcmp.gt.f32.partialorder %v422_v24, 0.0 }
  0xab   : > { %v447_v43 = vsel %vm431_vm4, %v393_v23, %v439_v34  ;;  %v448_v44 = vsel %vm432_vm5, %v422_v24, %v440_v35 }
  0xae   : > { %v395_v26 = vpop.f32.mrf.mxu0  ;;  %v424_v27 = vpop.f32.mrf.mxu1 }
  0xaf   : > { %v396_v30 = vadd.f32 %v395_v26, %v345_v18  ;;  %v425_v31 = vadd.f32 %v424_v27, %v345_v18  ;;  %v574_v27 = vld [vmem:[%s963_s5] sm:$0x7] }
  0xb1   : > { %vm433_vm2 = vcmp.gt.f32.partialorder %v396_v30, 0.0  ;;  %v441_v36 = vmul.f32 0.01, %v396_v30  ;;  %vm434_vm3 = vcmp.gt.f32.partialorder %v425_v31, 0.0  ;;  %v442_v37 = vmul.f32 0.01, %v425_v31 }
  0xb3   : > { %v449_v38 = vsel %vm433_vm2, %v396_v30, %v441_v36  ;;  %v450_v39 = vsel %vm434_vm3, %v425_v31, %v442_v37  ;;  %v579_v30 = vpop.permute.xlu2 %578 }
  0xb4   : > { %504 = vmatpush.msra.mxu2 %v449_v38  ;;  %533 = vmatpush.msra.mxu3 %v450_v39 }
  0xb6   : > { %505 = vmatpush.msra.mxu2 %v447_v43  ;;  %534 = vmatpush.msra.mxu3 %v448_v44 }
  0xb8   : > { %506 = vmatpush.msra.mxu2 %v445_v47  ;;  %535 = vmatpush.msra.mxu3 %v446_v48 }
  0xba   : > { %507 = vmatpush.msra.mxu2 %v443_v50  ;;  %536 = vmatpush.msra.mxu3 %v444_v51 }
  0xbb   : > { %736 = vmatmul.msk.f32.vlgmr.msra.gmra.mxu2 %vm479_vm10, %v451_v49  ;;  %740 = vmatmul.msk.f32.vlgmr.msra.gmra.mxu3 %vm479_vm10, %v451_v49 }
  0xc3   : > { %737 = vmatmul.msk.f32.gmra.mxu2 %vm479_vm10, %v452_v53  ;;  %741 = vmatmul.msk.f32.gmra.mxu3 %vm479_vm10, %v452_v53 }
  0xcb   : > { %738 = vmatmul.msk.f32.gmra.mxu2 %vm479_vm10, %v453_v55  ;;  %742 = vmatmul.msk.f32.gmra.mxu3 %vm479_vm10, %v453_v55 }
  0xd3   : > { %739 = vmatmul.msk.f32.gmra.mxu2 %vm479_vm10, %v454_v56  ;;  %743 = vmatmul.msk.f32.gmra.mxu3 %vm479_vm10, %v454_v56 }
 0x13e   : > { %v509_v57 = vpop.f32.mrf.mxu2  ;;  %v538_v58 = vpop.f32.mrf.mxu3 }
 0x13f   : > { %v510_v11 = vadd.f32 %v509_v57, %v462_v6  ;;  %v539_v12 = vadd.f32 %v538_v58, %v462_v6 }
 0x141   : > { %v558_v23 = vmul.f32 0.01, %v510_v11  ;;  %v559_v24 = vmul.f32 0.01, %v539_v12  ;;  %vm550_vm2 = vcmp.gt.f32.partialorder %v510_v11, 0.0  ;;  %vm551_vm3 = vcmp.gt.f32.partialorder %v539_v12, 0.0 }
 0x143   : > { %v566_v28 = vsel %vm550_vm2, %v510_v11, %v558_v23  ;;  %v567_v29 = vsel %vm551_vm3, %v539_v12, %v559_v24 }
 0x146   : > { %v512_v59 = vpop.f32.mrf.mxu2  ;;  %v541_v60 = vpop.f32.mrf.mxu3 }
 0x147   : > { %v513_v7 = vadd.f32 %v512_v59, %v467_v3  ;;  %v542_v8 = vadd.f32 %v541_v60, %v467_v3 }
 0x149   : > { %v560_v19 = vmul.f32 0.01, %v513_v7  ;;  %v561_v20 = vmul.f32 0.01, %v542_v8  ;;  %vm552_vm15 = vcmp.gt.f32.partialorder %v513_v7, 0.0  ;;  %vm553_vm1 = vcmp.gt.f32.partialorder %v542_v8, 0.0 }
 0x14b   : > { %v568_v25 = vsel %vm552_vm15, %v513_v7, %v560_v19  ;;  %v569_v26 = vsel %vm553_vm1, %v542_v8, %v561_v20 }
 0x14e   : > { %v515_v62 = vpop.f32.mrf.mxu2  ;;  %v544_v63 = vpop.f32.mrf.mxu3 }
 0x14f   : > { %v516_v1 = vadd.f32 %v515_v62, %v472_v0  ;;  %v545_v2 = vadd.f32 %v544_v63, %v472_v0 }
 0x151   : > { %v562_v13 = vmul.f32 0.01, %v516_v1  ;;  %v563_v14 = vmul.f32 0.01, %v545_v2  ;;  %vm554_vm13 = vcmp.gt.f32.partialorder %v516_v1, 0.0  ;;  %vm555_vm14 = vcmp.gt.f32.partialorder %v545_v2, 0.0 }
 0x153   : > { %v570_v21 = vsel %vm554_vm13, %v516_v1, %v562_v13  ;;  %v571_v22 = vsel %vm555_vm14, %v545_v2, %v563_v14 }
 0x156   : > { %v518_v4 = vpop.f32.mrf.mxu2  ;;  %v547_v5 = vpop.f32.mrf.mxu3 }
 0x157   : > { %v519_v9 = vadd.f32 %v518_v4, %v477_v61  ;;  %v548_v10 = vadd.f32 %v547_v5, %v477_v61 }
 0x159   : > { %vm556_vm11 = vcmp.gt.f32.partialorder %v519_v9, 0.0  ;;  %v564_v15 = vmul.f32 0.01, %v519_v9  ;;  %vm557_vm12 = vcmp.gt.f32.partialorder %v548_v10, 0.0  ;;  %v565_v16 = vmul.f32 0.01, %v548_v10 }
 0x15b   : > { %v572_v17 = vsel %vm556_vm11, %v519_v9, %v564_v15  ;;  %v573_v18 = vsel %vm557_vm12, %v548_v10, %v565_v16 }
 0x15c   : > { %596 = vmatpush.msrb.mxu0 %v572_v17  ;;  %616 = vmatpush.msrb.mxu1 %v573_v18 }
 0x15e   : > { %597 = vmatpush.msrb.mxu0 %v570_v21  ;;  %617 = vmatpush.msrb.mxu1 %v571_v22 }
 0x160   : > { %598 = vmatpush.msrb.mxu0 %v568_v25  ;;  %618 = vmatpush.msrb.mxu1 %v569_v26 }
 0x162   : > { %599 = vmatpush.msrb.mxu0 %v566_v28  ;;  %619 = vmatpush.msrb.mxu1 %v567_v29 }
 0x163   : > { %744 = vmatmul.msk.f32.vlgmr.msrb.gmra.mxu0 %vm479_vm10, %v574_v27  ;;  %745 = vmatmul.msk.f32.vlgmr.msrb.gmra.mxu1 %vm479_vm10, %v574_v27 }
 0x1e0   : > { %v601_v31 = vpop.f32.mrf.mxu0  ;;  %v621_v32 = vpop.f32.mrf.mxu1 }
 0x1e1   : > { %v622_v33 = vadd.f32 %v621_v32, %v579_v30  ;;  %v602_v34 = vadd.f32 %v601_v31, %v579_v30 }
 0x1e3   : > { %v626_v35 = vrot.slane %v622_v33, 4 }
 0x1e5   : > { %v627_v36 = vsel %vm364_vm0, %v602_v34, %v626_v35 }
 0x1e6   : > { %629 = vst [vmem:[%s316_s11] sm:$0x77] %v627_v36 }
 0x1e7 PF: > { %s17_s26 = sadd.s32 1, %s800_s26   ;;  %s966_s24 = smov %s796_s25 }
 0x1e8   : > { %p14_p5 = scmp.ge.s32.totalorder %s17_s26, 4   ;;  %s967_s25 = smov %s969_s27 }
 0x1ea   :  { %16 = sbr.rel (!%p14_p5) target bundleno = 2 (0x2), region = 78 }

</bundles_post_ra>
